<compile_context>
chip_gen: v7x
topology: tpu7x:2x2x1
jax: 0.10.0
libtpu: 0.0.40
codegen_flags: <defaults>
</compile_context>

<pallas_src>
import functools
import math

import jax
import jax.numpy as jnp
from jax.experimental import pallas as pl
from jax.experimental.pallas import tpu as pltpu


def _rmsnorm_kernel(x_ref, w_ref, o_ref, *, eps: float):
    # x_ref: (tile_rows, hidden)   w_ref: (1, hidden)   o_ref: (tile_rows, hidden)
    xf = x_ref[...].astype(jnp.float32)
    # Mean of squares over the hidden (last) axis -> XLU reduce; rsqrt -> EUP.
    ms = jnp.mean(xf * xf, axis=-1, keepdims=True)
    inv = jax.lax.rsqrt(ms + eps)
    w = w_ref[...].astype(jnp.float32)  # (1, hidden) broadcasts over rows
    o_ref[...] = (xf * inv * w).astype(o_ref.dtype)


def _round_up(x: int, m: int) -> int:
    return ((x + m - 1) // m) * m


# ~4 MiB of *input* per grid step: inside the reviewed sweet spot for every
# generation (2-4 MiB v5e, 4-8 MiB v6e, 4-6 MiB v7x). Big enough that the
# ~0.35 us per-step pipeline overhead is <5% of the step even at v7x HBM
# bandwidth; small enough that the double-buffered in+out blocks plus f32
# temporaries stay well under the scoped VMEM limit everywhere.
_TARGET_BLOCK_BYTES = 4 * 1024 * 1024


def _vmem_capacity_bytes() -> int:
    """Physical VMEM capacity of the current chip (conservative fallback)."""
    try:
        return int(pltpu.get_tpu_info().vmem_capacity_bytes)
    except Exception:
        # Assume the smallest current generation (v7x: 64 MiB per core).
        return 64 * 1024 * 1024


def _vmem_limit_bytes(capacity: int) -> int:
    # Leave headroom below physical capacity; 64 MiB is ample for this kernel
    # and safe on v5e/v6e (128 MiB); v7x (64 MiB) gets 48 MiB.
    return max(32 * 1024 * 1024, min(64 * 1024 * 1024, (capacity * 3) // 4))


def _row_alignment(itemsize: int) -> int:
    # Sub-32-bit dtypes pack 2/4 rows per sublane: align tile_rows so every
    # block fills whole packed sublanes (8 for f32, 16 for bf16, 32 for int8).
    return max(8, 32 // max(1, itemsize))


def _choose_tile_rows(rows: int, hidden: int, itemsize: int,
                      vmem_limit: int) -> int:
    align = _row_alignment(itemsize)
    t = _TARGET_BLOCK_BYTES // max(1, hidden * itemsize)
    t = max(align, (t // align) * align)

    # Budget: 2x double-buffered input + 2x double-buffered output blocks,
    # plus ~2 f32-sized temporaries (xf / xf*xf / xf*inv*w materialization)
    # inside the kernel. Keep it under ~3/4 of the scoped VMEM limit.
    budget = (vmem_limit * 3) // 4

    def footprint(tile_r: int) -> int:
        blk = tile_r * hidden * itemsize
        f32_blk = tile_r * hidden * 4
        return 4 * blk + 2 * f32_blk

    while t > align and footprint(t) > budget:
        t -= align

    t = min(t, _round_up(rows, align))  # never larger than needed
    return max(t, align)


def rmsnorm(x: jax.Array, weight: jax.Array, eps: float = 1e-5,
            tile_rows: int | None = None) -> jax.Array:
    """RMSNorm over the last axis of x. weight has shape (hidden,)."""
    orig_shape = x.shape
    hidden = orig_shape[-1]
    rows = math.prod(orig_shape[:-1]) if len(orig_shape) > 1 else 1

    x2d = x.reshape(rows, hidden)
    w2d = weight.reshape(1, hidden)

    itemsize = x2d.dtype.itemsize
    vmem_limit = _vmem_limit_bytes(_vmem_capacity_bytes())
    if tile_rows is None:
        tile_rows = _choose_tile_rows(rows, hidden, itemsize, vmem_limit)

    # No host-side padding: Pallas masks writes of the ragged last block, and
    # the reduction is per-row so padded rows cannot affect valid output rows.
    grid = (pl.cdiv(rows, tile_rows),)

    # Advisory cost model: this kernel is pure HBM-bandwidth-bound.
    cost = pl.CostEstimate(
        flops=4 * rows * hidden,                    # sq, reduce, scale, weight
        transcendentals=rows,                       # one rsqrt per row
        bytes_accessed=2 * rows * hidden * itemsize + hidden * weight.dtype.itemsize,
    )

    out = pl.pallas_call(
        functools.partial(_rmsnorm_kernel, eps=eps),
        out_shape=jax.ShapeDtypeStruct((rows, hidden), x.dtype),
        grid_spec=pltpu.PrefetchScalarGridSpec(
            num_scalar_prefetch=0,
            grid=grid,
            in_specs=[
                pl.BlockSpec((tile_rows, hidden), lambda i: (i, 0)),
                # Constant block index -> weight is not re-fetched per step.
                pl.BlockSpec((1, hidden), lambda i: (0, 0)),
            ],
            out_specs=pl.BlockSpec((tile_rows, hidden), lambda i: (i, 0)),
        ),
        compiler_params=pltpu.CompilerParams(
            # Row axis is independent work; "parallel" lets the compiler shard
            # it across both v7x TensorCores (moot on single-TC v5e/v6e).
            dimension_semantics=("parallel",),
            vmem_limit_bytes=vmem_limit,
        ),
        cost_estimate=cost,
    )(x2d, w2d)

    return out.reshape(orig_shape)


def rmsnorm_ref(x, weight, eps=1e-5):
    xf = x.astype(jnp.float32)
    ms = jnp.mean(xf * xf, axis=-1, keepdims=True)
    return (weight.astype(jnp.float32) * (xf * jax.lax.rsqrt(ms + eps))).astype(x.dtype)


if __name__ == "__main__":
    key = jax.random.PRNGKey(0)
    batch, seq, hidden = 2, 8, 128
    x = jax.random.normal(key, (batch, seq, hidden), dtype=jnp.float32)

    # Deterministic parameter init (matches nn.init.ones_ in the module).
    weight = jnp.ones((hidden,), dtype=jnp.float32)

    out = rmsnorm(x, weight, eps=1e-5)
    out = jax.block_until_ready(out)

    ref = rmsnorm_ref(x, weight, eps=1e-5)
    assert out.shape == x.shape and out.dtype == x.dtype
    assert jnp.allclose(out, ref, atol=1e-5, rtol=1e-5), "mismatch vs reference"

    # Ragged grid (rows not a multiple of tile_rows) with a forced small tile
    # to exercise masked last-block writes.
    x2 = jax.random.normal(jax.random.PRNGKey(1), (3, 7, hidden), dtype=jnp.float32)
    out2 = jax.block_until_ready(rmsnorm(x2, weight, eps=1e-5, tile_rows=16))
    assert jnp.allclose(out2, rmsnorm_ref(x2, weight, eps=1e-5), atol=1e-5, rtol=1e-5)

    # bf16 path (exercises packed-sublane tile alignment and f32 accumulation).
    x3 = jax.random.normal(jax.random.PRNGKey(2), (2, 16, hidden), dtype=jnp.bfloat16)
    w3 = jnp.ones((hidden,), dtype=jnp.bfloat16)
    out3 = jax.block_until_ready(rmsnorm(x3, w3, eps=1e-5))
    ref3 = rmsnorm_ref(x3, w3, eps=1e-5)
    assert out3.dtype == jnp.bfloat16
    assert jnp.allclose(out3.astype(jnp.float32), ref3.astype(jnp.float32),
                        atol=2e-2, rtol=2e-2)

    print("KERNEL_OK")
</pallas_src>

<mosaic_0001>
module attributes {stable_mosaic.version = 11 : i64} {
  func.func @_rmsnorm_kernel(%arg0: i32, %arg1: memref<16x128xf32, #tpu.memory_space<vmem>>, %arg2: memref<1x128xf32, #tpu.memory_space<vmem>>, %arg3: memref<16x128xf32, #tpu.memory_space<vmem>>) attributes {dimension_semantics = [#tpu.dimension_semantics<parallel>], iteration_bounds = array<i64: 1>, scalar_prefetch = 0 : i64, scratch_operands = 0 : i64, tpu.core_type = #tpu.core_type<tc>, window_params = [{transform_indices = @transform_0, window_bounds = array<i64: 16, 128>}, {pipeline_mode = #tpu.pipeline_mode<synchronous>, transform_indices = @transform_1, window_bounds = array<i64: 1, 128>}, {transform_indices = @transform_2, window_bounds = array<i64: 16, 128>}]} {
    %c0 = arith.constant 0 : index
    %c0_0 = arith.constant 0 : index
    %0 = vector.load %arg1[%c0, %c0_0] : memref<16x128xf32, #tpu.memory_space<vmem>>, vector<16x128xf32>
    %1 = arith.mulf %0, %0 : vector<16x128xf32>
    %cst = arith.constant dense<0.000000e+00> : vector<16xf32>
    %2 = vector.multi_reduction <add>, %1, %cst [1] : vector<16x128xf32> to vector<16xf32>
    %3 = vector.shape_cast %2 : vector<16xf32> to vector<16x1xf32>
    %cst_1 = arith.constant 1.280000e+02 : f32
    %4 = vector.broadcast %cst_1 : f32 to vector<16x1xf32>
    %5 = arith.divf %3, %4 : vector<16x1xf32>
    %cst_2 = arith.constant 9.99999974E-6 : f32
    %6 = vector.broadcast %cst_2 : f32 to vector<16x1xf32>
    %7 = arith.addf %5, %6 : vector<16x1xf32>
    %8 = math.rsqrt %7 : vector<16x1xf32>
    %c0_3 = arith.constant 0 : index
    %c0_4 = arith.constant 0 : index
    %9 = vector.load %arg2[%c0_3, %c0_4] : memref<1x128xf32, #tpu.memory_space<vmem>>, vector<1x128xf32>
    %10 = vector.broadcast %8 : vector<16x1xf32> to vector<16x128xf32>
    %11 = arith.mulf %0, %10 : vector<16x128xf32>
    %12 = vector.broadcast %9 : vector<1x128xf32> to vector<16x128xf32>
    %13 = arith.mulf %11, %12 : vector<16x128xf32>
    %c0_5 = arith.constant 0 : index
    %c0_6 = arith.constant 0 : index
    %14 = vector.load %arg3[%c0_5, %c0_6] : memref<16x128xf32, #tpu.memory_space<vmem>>, vector<16x128xf32>
    tpu.vector_store %arg3[%c0_5, %c0_6], %13 {strides = array<i32>} : memref<16x128xf32, #tpu.memory_space<vmem>>, vector<16x128xf32>,
    return
  }
  func.func @transform_0(%arg0: i32) -> (i32, i32) {
    %c0_i32 = arith.constant 0 : i32
    %c0_i32_0 = arith.constant 0 : i32
    return %arg0, %c0_i32 : i32, i32
  }
  func.func @transform_1(%arg0: i32) -> (i32, i32) {
    %c0_i32 = arith.constant 0 : i32
    %c0_i32_0 = arith.constant 0 : i32
    %c0_i32_1 = arith.constant 0 : i32
    return %c0_i32, %c0_i32_0 : i32, i32
  }
  func.func @transform_2(%arg0: i32) -> (i32, i32) {
    %c0_i32 = arith.constant 0 : i32
    %c0_i32_0 = arith.constant 0 : i32
    return %arg0, %c0_i32 : i32, i32
  }
}

</mosaic_0001>

<bundles_post_ra>
// kernel: tpu_custom_call.1
= control target key start
LH: loop header
LB: loop body
LE: loop exit
PB: predicated region body
PF: predicated region fallthrough
CT: control target
= control target key end

     0   :  { %7 = vsyncpa [#allocation3], 0  ;;  %s180_s0 = inlined_call_operand.hbm [shape: f32[16,128], index: 0, kind: input, shape index: {}]   ;;  %s181_s1 = inlined_call_operand.vmem [shape: f32[1,128], index: 1, kind: input, shape index: {}]   ;;  %s182_s2 = inlined_call_operand.hbm [shape: f32[16,128], index: 2, kind: output, shape index: {}]  }
   0x1   :  { %8 = vsyncpa [#allocation4], 0  ;;  %s128_s9 = smov [#allocation2]   ;;  %s80_s13 = scalar_lea.hbm %s180_s0, 256 }
   0x2   :  { %s14_s10 = sshll.u32 %s128_s9, 4  ;;  %p81_p0 = scmp.ne.s32.totalorder %s180_s0, %s80_s13  ;;  %s15_s10 = int_to_ptr.vmem [resolvable:$true] %s14_s10 }
   0x3   :  { %p84_p1 = scmp.lt.u32.totalorder %s80_s13, %s180_s0 }
   0x5   :  { %p86_p2 = pnand %p84_p1, %p81_p0 }
   0x7   :  { %89 = shalt.err (!%p86_p2)
}
   0x8   :  { %s90_s18 = scalar_lea.vmem %s15_s10, 256  ;;  %p95_p4 = scmp.lt.s32.totalorder %s15_s10, %s15_s10 }
   0x9   :  { %p91_p3 = scmp.ne.s32.totalorder %s15_s10, %s90_s18  ;;  %p96_p5 = scmp.lt.s32.totalorder %s90_s18, %s90_s18 }
   0xb   :  { %p97_p6 = por %p96_p5, %p95_p4 }
   0xd   :  { %p98_p7 = pnand %p97_p6, %p91_p3 }
   0xf   :  { %101 = shalt.err (!%p98_p7)
}
  0x10   :  { %s129_s19 = smov 128   ;;  %s130_s20 = smov 8  }
  0x11   :  { %20 = dma.hbm_to_vmem [thread:$0]  %s180_s0, 256, %s15_s10, [#allocation3], %s129_s19, %s129_s19, %s130_s20  }
  0x12   :  { %124 = dma.done.wait [#allocation3], 256  }
  0x13   :  { %125 = vsyncadd [#allocation3], 4294967040  ;;  %v26_v0 = vld [vmem:[#allocation2] sm:$0xff]  ;;  %v27_v1 = vld [vmem:[#allocation2 + $0x8] sm:$0xff]  ;;  %s131_s0 = smov [#allocation5]  }
  0x14   :  { %v28_v2 = vmul.f32 %v26_v0, %v26_v0  ;;  %v29_v3 = vmul.f32 %v27_v1, %v27_v1  ;;  %v71_v11 = vld [vmem:[%s181_s1] ss:$0 sm:$0xff]  ;;  %s59_s25 = sshll.u32 %s131_s0, 4  ;;  %s60_s25 = int_to_ptr.vmem [resolvable:$true] %s59_s25 }
  0x15   :  { %s102_s26 = scalar_lea.vmem %s60_s25, 256  ;;  %p107_p9 = scmp.lt.s32.totalorder %s60_s25, %s60_s25 }
  0x16   :  { %30 = vadd.xlane.f32.xlu0 %v28_v2  ;;  %p103_p8 = scmp.ne.s32.totalorder %s60_s25, %s102_s26  ;;  %p108_p10 = scmp.lt.s32.totalorder %s102_s26, %s102_s26 }
  0x18   :  { %p109_p11 = por %p108_p10, %p107_p9 }
  0x1a   :  { %32 = vadd.xlane.f32.xlu0 %v29_v3  ;;  %p110_p12 = pnand %p109_p11, %p103_p8 }
  0xa3   :  { %v31_v4 = vpop.xlane.xlu0 %30 }
  0xa4   :  { %v35_v5 = vmul.f32 0.0078125, %v31_v4 }
  0xa6   :  { %v37_v6 = vadd.f32 1e-05, %v35_v5 }
  0xa7   :  { %v33_v7 = vpop.xlane.xlu0 %32 }
  0xa8   :  { %76 = vrsqrt.f32 %v37_v6  ;;  %v36_v8 = vmul.f32 0.0078125, %v33_v7 }
  0xaa   :  { %v38_v9 = vadd.f32 1e-05, %v36_v8 }
  0xac   :  { %78 = vrsqrt.f32 %v38_v9 }
  0xb2   :  { %v77_v10 = vpop.eup %76 }
  0xb3   :  { %v42_v12 = vmul.f32 %v77_v10, %v26_v0 }
  0xb5   :  { %v50_v13 = vmul.f32 %v71_v11, %v42_v12 }
  0xb6   :  { %v79_v14 = vpop.eup %78 }
  0xb7   :  { %v43_v15 = vmul.f32 %v79_v14, %v27_v1  ;;  %52 = vst [vmem:[#allocation5] sm:$0xff] %v50_v13 }
  0xb9   :  { %v51_v16 = vmul.f32 %v71_v11, %v43_v15 }
  0xbb   :  { %53 = vst [vmem:[#allocation5 + $0x8] sm:$0xff] %v51_v16 }
  0xbc   :  { %113 = shalt.err (!%p110_p12)
}
  0xbd   :  { %s114_s1 = scalar_lea.hbm %s182_s2, 256 }
  0xbe   :  { %p115_p13 = scmp.ne.s32.totalorder %s182_s2, %s114_s1  ;;  %p118_p0 = scmp.lt.u32.totalorder %s114_s1, %s182_s2 }
  0xc0   :  { %p120_p1 = pnand %p118_p0, %p115_p13 }
  0xc2   :  { %123 = shalt.err (!%p120_p1)
}
  0xc3   :  { %65 = dma.vmem_to_hbm [thread:$0]  %s60_s25, 256, %s182_s2, [#allocation4], %s129_s19, %s129_s19, %s130_s20  }
  0xc4   :  { %126 = dma.done.wait [#allocation4], 256  }
  0xc5   :  { %127 = vsyncadd [#allocation4], 4294967040 }
  0xc6   :  { %69 = vsyncpa [#allocation3], 1 }
  0xc7   :  { %70 = vsyncpa [#allocation4], 1 }

</bundles_post_ra>
